<compile_context>
chip_gen: v5e
topology: v5e:2x2
jax: 0.10.0
libtpu: 0.0.40
codegen_flags: <defaults>
</compile_context>

<pallas_src>
import functools

import jax
import jax.numpy as jnp
from jax import lax
from jax.experimental import pallas as pl
from jax.experimental.pallas import tpu as pltpu


# --------------------------------------------------------------------------- #
# Kernel
# --------------------------------------------------------------------------- #
def _loss_kernel(x_ref, y_ref, o_ref, *, block_rows, batch):
    i = pl.program_id(0)

    x = x_ref[...].astype(jnp.float32)   # (block_rows, D)
    y = y_ref[...].astype(jnp.float32)

    # F.normalize eps = 1e-12 clamps the *norm*; clamping the sum-of-squares at
    # eps^2 under the rsqrt is exactly equivalent.
    eps2 = jnp.float32(1e-24)

    sxx = jnp.sum(x * x, axis=-1, keepdims=True)   # (block_rows, 1)  VPU + XLU
    syy = jnp.sum(y * y, axis=-1, keepdims=True)
    sxy = jnp.sum(x * y, axis=-1, keepdims=True)

    inv = lax.rsqrt(jnp.maximum(sxx, eps2)) * lax.rsqrt(jnp.maximum(syy, eps2))
    row_loss = 2.0 - 2.0 * (sxy * inv)              # (block_rows, 1)

    # Fast path: full blocks just sum all rows. Lane-dense (1, 128) store of
    # this block's partial sum (same value in all lanes; wrapper reads lane 0).
    o_ref[...] = jnp.broadcast_to(jnp.sum(row_loss), (1, 128)).astype(jnp.float32)

    if batch % block_rows != 0:
        # Only the last grid step can contain padded rows; mask them there.
        @pl.when(i == pl.num_programs(0) - 1)
        def _():
            rows = lax.broadcasted_iota(jnp.int32, (block_rows, 1), 0)
            valid = (i * block_rows + rows) < batch
            masked = jnp.sum(jnp.where(valid, row_loss, 0.0))
            o_ref[...] = jnp.broadcast_to(masked, (1, 128)).astype(jnp.float32)


# --------------------------------------------------------------------------- #
# Tiling / VMEM sizing
# --------------------------------------------------------------------------- #
def _round_up(v, m):
    return ((v + m - 1) // m) * m


def _vmem_capacity_bytes():
    """Physical VMEM per TensorCore; conservative fallback if query fails."""
    try:
        info = pltpu.get_tpu_info()
        cap = getattr(info, "vmem_capacity_bytes", None)
        if cap:
            return int(cap)
    except Exception:
        pass
    return 64 * 1024 * 1024   # v7x per-TC size: the smallest current generation


def _vmem_limit_bytes():
    cap = _vmem_capacity_bytes()
    # ~75% of physical, leaving >= 8 MiB headroom for Mosaic internal scratch.
    limit = min(cap - (8 << 20), int(cap * 0.75))
    return max(limit, 16 << 20)


def _pick_block_rows(batch, feat, in_itemsize, vmem_limit):
    """Largest batch tile whose full per-step working set fits the budget,
    while keeping enough grid steps for pipelining / megacore."""
    if batch <= 8:
        return batch   # single tiny block; full-dim block shape is legal.

    # Per-step working set: 2 inputs x 2 pipeline buffers at the *input* dtype
    # plus ~4 live f32 tiles (x/y upcasts and the elementwise products) that
    # the kernel body materializes before reduction.
    per_row = feat * (4 * in_itemsize + 4 * 4)
    step_budget = int(vmem_limit * 0.55)
    tb = step_budget // max(per_row, 1)

    # Keep >= ~8 grid steps so BlockSpec double-buffering overlaps DMA with
    # compute and v7x's two TensorCores both get work.
    min_steps = 8
    tb_for_steps = max(8, _round_up(pl.cdiv(batch, min_steps), 8))
    tb = min(tb, tb_for_steps)
    tb = max(8, (tb // 8) * 8)            # sublane-dim multiple of 8
    return tb


# --------------------------------------------------------------------------- #
# Wrapper
# --------------------------------------------------------------------------- #
def loss_fn(x, y, *, block_rows=None, cast_to_bf16=False):
    """BYOL-style loss, exact semantics of Loss_Fn.forward. Returns scalar f32.

    Accepts any rank >= 2; normalization / dot are along the last dim and the
    mean is over all leading dims (matching torch.mean over the reduced tensor).
    Set cast_to_bf16=True to halve HBM traffic (slight numerics change).
    """
    assert x.shape == y.shape and x.ndim >= 2
    D = x.shape[-1]
    x = x.reshape(-1, D)
    y = y.reshape(-1, D)
    B = x.shape[0]

    if cast_to_bf16 and x.dtype == jnp.float32:
        x = x.astype(jnp.bfloat16)
        y = y.astype(jnp.bfloat16)

    vmem_limit = _vmem_limit_bytes()
    itemsize = jnp.dtype(x.dtype).itemsize
    tb = block_rows if block_rows is not None else _pick_block_rows(B, D, itemsize, vmem_limit)
    nb = pl.cdiv(B, tb)

    kernel = functools.partial(_loss_kernel, block_rows=tb, batch=B)
    out = pl.pallas_call(
        kernel,
        out_shape=jax.ShapeDtypeStruct((1, nb * 128), jnp.float32),
        grid=(nb,),
        in_specs=[
            pl.BlockSpec((tb, D), lambda i: (i, 0)),
            pl.BlockSpec((tb, D), lambda i: (i, 0)),
        ],
        out_specs=pl.BlockSpec((1, 128), lambda i: (0, i)),
        compiler_params=pltpu.CompilerParams(
            dimension_semantics=("parallel",),
            vmem_limit_bytes=int(vmem_limit),
        ),
    )(x, y)

    # Tiny final reduction in JAX: sum of per-block partials, divide by true B.
    partials = out.reshape(nb, 128)[:, 0]
    return jnp.sum(partials) / jnp.float32(B)


def _ref_loss(x, y):
    x = x.astype(jnp.float32)
    y = y.astype(jnp.float32)
    xn = x / jnp.maximum(jnp.linalg.norm(x, axis=-1, keepdims=True), 1e-12)
    yn = y / jnp.maximum(jnp.linalg.norm(y, axis=-1, keepdims=True), 1e-12)
    return jnp.mean(2.0 - 2.0 * jnp.sum(xn * yn, axis=-1))


if __name__ == "__main__":
    key = jax.random.PRNGKey(0)
    kx, ky = jax.random.split(key)

    # Small shapes consistent with the module: [batch, hidden].
    B, D = 8, 32
    x = jax.random.normal(kx, (B, D), dtype=jnp.float32)
    y = jax.random.normal(ky, (B, D), dtype=jnp.float32)
    loss = jax.block_until_ready(loss_fn(x, y))
    ref = _ref_loss(x, y)
    assert jnp.allclose(loss, ref, atol=1e-5, rtol=1e-5), (loss, ref)

    # Multi-block path with a ragged tail (explicit tile size).
    B2, D2 = 50, 256
    x2 = jax.random.normal(kx, (B2, D2), dtype=jnp.float32)
    y2 = jax.random.normal(ky, (B2, D2), dtype=jnp.float32)
    loss2 = jax.block_until_ready(loss_fn(x2, y2, block_rows=16))
    ref2 = _ref_loss(x2, y2)
    assert jnp.allclose(loss2, ref2, atol=1e-5, rtol=1e-5), (loss2, ref2)

    # Auto-tiling path: multiple grid steps + masked tail picked automatically.
    B3, D3 = 200, 128
    x3 = jax.random.normal(kx, (B3, D3), dtype=jnp.float32)
    y3 = jax.random.normal(ky, (B3, D3), dtype=jnp.float32)
    loss3 = jax.block_until_ready(loss_fn(x3, y3))
    ref3 = _ref_loss(x3, y3)
    assert jnp.allclose(loss3, ref3, atol=1e-5, rtol=1e-5), (loss3, ref3)

    # Rank-3 input (normalize along last dim, mean over all leading dims).
    x4 = jax.random.normal(kx, (2, 9, 64), dtype=jnp.float32)
    y4 = jax.random.normal(ky, (2, 9, 64), dtype=jnp.float32)
    loss4 = jax.block_until_ready(loss_fn(x4, y4))
    ref4 = _ref_loss(x4, y4)
    assert jnp.allclose(loss4, ref4, atol=1e-5, rtol=1e-5), (loss4, ref4)

    # Optional reduced-HBM-traffic path (slightly different numerics).
    loss5 = jax.block_until_ready(loss_fn(x3, y3, cast_to_bf16=True))
    assert jnp.allclose(loss5, ref3, atol=2e-2, rtol=2e-2), (loss5, ref3)

    print("KERNEL_OK")
</pallas_src>

<mosaic_0001>
module attributes {stable_mosaic.version = 11 : i64} {
  func.func @_loss_kernel(%arg0: i32, %arg1: memref<8x32xf32, #tpu.memory_space<vmem>>, %arg2: memref<8x32xf32, #tpu.memory_space<vmem>>, %arg3: memref<1x128xf32, #tpu.memory_space<vmem>>) attributes {dimension_semantics = [#tpu.dimension_semantics<parallel>], iteration_bounds = array<i64: 1>, scalar_prefetch = 0 : i64, scratch_operands = 0 : i64, tpu.core_type = #tpu.core_type<tc>, window_params = [{transform_indices = @transform_0, window_bounds = array<i64: 8, 32>}, {transform_indices = @transform_1, window_bounds = array<i64: 8, 32>}, {transform_indices = @transform_2, window_bounds = array<i64: 1, 128>}]} {
    %c0 = arith.constant 0 : index
    %c0_0 = arith.constant 0 : index
    %0 = vector.load %arg1[%c0, %c0_0] : memref<8x32xf32, #tpu.memory_space<vmem>>, vector<8x32xf32>
    %c0_1 = arith.constant 0 : index
    %c0_2 = arith.constant 0 : index
    %1 = vector.load %arg2[%c0_1, %c0_2] : memref<8x32xf32, #tpu.memory_space<vmem>>, vector<8x32xf32>
    %2 = arith.mulf %0, %0 : vector<8x32xf32>
    %cst = arith.constant dense<0.000000e+00> : vector<8xf32>
    %3 = vector.multi_reduction <add>, %2, %cst [1] : vector<8x32xf32> to vector<8xf32>
    %4 = vector.shape_cast %3 : vector<8xf32> to vector<8x1xf32>
    %5 = arith.mulf %1, %1 : vector<8x32xf32>
    %cst_3 = arith.constant dense<0.000000e+00> : vector<8xf32>
    %6 = vector.multi_reduction <add>, %5, %cst_3 [1] : vector<8x32xf32> to vector<8xf32>
    %7 = vector.shape_cast %6 : vector<8xf32> to vector<8x1xf32>
    %8 = arith.mulf %0, %1 : vector<8x32xf32>
    %cst_4 = arith.constant dense<0.000000e+00> : vector<8xf32>
    %9 = vector.multi_reduction <add>, %8, %cst_4 [1] : vector<8x32xf32> to vector<8xf32>
    %10 = vector.shape_cast %9 : vector<8xf32> to vector<8x1xf32>
    %cst_5 = arith.constant 1.000000e-24 : f32
    %11 = vector.broadcast %cst_5 : f32 to vector<8x1xf32>
    %12 = arith.maximumf %4, %11 : vector<8x1xf32>
    %13 = math.rsqrt %12 : vector<8x1xf32>
    %cst_6 = arith.constant 1.000000e-24 : f32
    %14 = vector.broadcast %cst_6 : f32 to vector<8x1xf32>
    %15 = arith.maximumf %7, %14 : vector<8x1xf32>
    %16 = math.rsqrt %15 : vector<8x1xf32>
    %17 = arith.mulf %13, %16 : vector<8x1xf32>
    %18 = arith.mulf %10, %17 : vector<8x1xf32>
    %cst_7 = arith.constant 2.000000e+00 : f32
    %19 = vector.broadcast %cst_7 : f32 to vector<8x1xf32>
    %20 = arith.mulf %19, %18 : vector<8x1xf32>
    %cst_8 = arith.constant 2.000000e+00 : f32
    %21 = vector.broadcast %cst_8 : f32 to vector<8x1xf32>
    %22 = arith.subf %21, %20 : vector<8x1xf32>
    %23 = vector.shape_cast %22 : vector<8x1xf32> to vector<1x8x1xf32>
    %cst_9 = arith.constant dense<0.000000e+00> : vector<1xf32>
    %24 = vector.multi_reduction <add>, %23, %cst_9 [1, 2] : vector<1x8x1xf32> to vector<1xf32>
    %25 = vector.shape_cast %24 : vector<1xf32> to vector<1x1x1xf32>
    %26 = vector.extract %25[0, 0, 0] : f32 from vector<1x1x1xf32>
    %27 = vector.broadcast %26 : f32 to vector<1x128xf32>
    %c0_10 = arith.constant 0 : index
    %c0_11 = arith.constant 0 : index
    %28 = vector.load %arg3[%c0_10, %c0_11] : memref<1x128xf32, #tpu.memory_space<vmem>>, vector<1x128xf32>
    tpu.vector_store %arg3[%c0_10, %c0_11], %27 {strides = array<i32>} : memref<1x128xf32, #tpu.memory_space<vmem>>, vector<1x128xf32>,
    return
  }
  func.func @transform_0(%arg0: i32) -> (i32, i32) {
    %c0_i32 = arith.constant 0 : i32
    %c0_i32_0 = arith.constant 0 : i32
    return %arg0, %c0_i32 : i32, i32
  }
  func.func @transform_1(%arg0: i32) -> (i32, i32) {
    %c0_i32 = arith.constant 0 : i32
    %c0_i32_0 = arith.constant 0 : i32
    return %arg0, %c0_i32 : i32, i32
  }
  func.func @transform_2(%arg0: i32) -> (i32, i32) {
    %c0_i32 = arith.constant 0 : i32
    %c0_i32_0 = arith.constant 0 : i32
    return %c0_i32, %arg0 : i32, i32
  }
}

</mosaic_0001>

<bundles_post_ra>
// kernel: tpu_custom_call.1
= control target key start
LH: loop header
LB: loop body
LE: loop exit
PB: predicated region body
PF: predicated region fallthrough
CT: control target
= control target key end

     0   :  { %7 = vsyncpa [#allocation3], 0  ;;  %s226_s0 = inlined_call_operand.hbm [shape: f32[8,32], index: 0, kind: input, shape index: {}]   ;;  %s227_s1 = inlined_call_operand.hbm [shape: f32[8,32], index: 1, kind: input, shape index: {}]   ;;  %s228_s2 = inlined_call_operand.hbm [shape: f32[1,128], index: 2, kind: output, shape index: {}]  }
   0x1   :  { %8 = vsyncpa [#allocation6], 0 }
   0x2   :  { %9 = vsyncpa [#allocation4], 0  ;;  %s15_s11 = sshll.u32 %s226_s0, 4  ;;  %s199_s12 = smov [#allocation2]   ;;  %s16_s11 = int_to_ptr.hbm [resolvable:$true] %s15_s11 }
   0x3   :  { %s17_s13 = sshll.u32 %s199_s12, 4  ;;  %s26_s16 = sshll.u32 %s227_s1, 4  ;;  %s18_s13 = int_to_ptr.vmem [resolvable:$true] %s17_s13  ;;  %s27_s16 = int_to_ptr.hbm [resolvable:$true] %s26_s16 }
   0x4   :  { %20 = dma.hbm_to_vmem [thread:$0]  %s16_s11, 128, %s18_s13, [#allocation3]  }
   0x5   :  { %s200_s17 = smov [#allocation5]  }
   0x6   :  { %s28_s18 = sshll.u32 %s200_s17, 4  ;;  %s29_s18 = int_to_ptr.vmem [resolvable:$true] %s28_s18 }
   0x7   :  { %31 = dma.hbm_to_vmem [thread:$0]  %s27_s16, 128, %s29_s18, [#allocation6]  }
   0x8   :  { %193 = dma.done.wait [#allocation3], 128  }
   0x9   :  { %194 = vsyncadd [#allocation3], 4294967168 }
   0xa   :  { %195 = dma.done.wait [#allocation6], 128  }
   0xb   :  { %196 = vsyncadd [#allocation6], 4294967168  ;;  %v40_v0 = vld [vmem:[#allocation2] sm:$0xff]  ;;  %vm43_vm0 = vcmask 261120   ;;  %v41_v1 = vld [vmem:[#allocation5] sm:$0xff]  ;;  %vm81_vm7 = vcmask 7168  }
   0xc   :  { %v42_v2 = vmul.f32 %v40_v0, %v40_v0  ;;  %v51_v3 = vmul.f32 %v41_v1, %v40_v0  ;;  %v47_v6 = vmul.f32 %v41_v1, %v41_v1  ;;  %s201_s0 = smov [#allocation7]   ;;  %s101_s21 = sshll.u32 %s228_s2, 4  ;;  %s102_s21 = int_to_ptr.hbm [resolvable:$true] %s101_s21 }
   0xd   :  { %s99_s1 = sshll.u32 %s201_s0, 4  ;;  %s100_s1 = int_to_ptr.vmem [resolvable:$true] %s99_s1 }
   0xe   :  { %v44_v4 = vsel %vm43_vm0, %v42_v2, 0.0  ;;  %v52_v5 = vsel %vm43_vm0, %v51_v3, 0.0  ;;  %v48_v7 = vsel %vm43_vm0, %v47_v6, 0.0 }
   0xf   :  { %45 = vadd.xlane.f32.xlu0 %v44_v4  ;;  %53 = vadd.xlane.f32.xlu1 %v52_v5 }
  0x17   :  { %49 = vadd.xlane.f32.xlu0 %v48_v7 }
  0x82   :  { %v46_v8 = vpop.xlane.xlu0 %45  ;;  %v54_v24 = vpop.xlane.xlu1 %53 }
  0x83   :  { %v55_v9 = vmax.f32 %v46_v8, 1e-24 }
  0x85   :  { %117 = vrsqrt.f32 %v55_v9  ;;  %vm62_vm3 = vweird.f32 %v55_v9 }
  0x8a   :  { %v50_v10 = vpop.xlane.xlu0 %49 }
  0x8b   :  { %v118_v11 = vpop.eup %117  ;;  %v66_v12 = vmax.f32 %v50_v10, 1e-24 }
  0x8c   :  { %v57_v13 = vmul.f32 %v118_v11, %v55_v9  ;;  %vm63_vm1 = vweird.f32 %v118_v11 }
  0x8d   :  { %119 = vrsqrt.f32 %v66_v12  ;;  %vm73_vm4 = vweird.f32 %v66_v12  ;;  %vm64_vm5 = vmor %vm62_vm3, %vm63_vm1 }
  0x8e   :  { %v58_v14 = vmul.f32 %v118_v11, %v57_v13 }
  0x90   :  { %v59_v15 = vmul.f32 0.5, %v58_v14 }
  0x92   :  { %v60_v18 = vsub.f32 1.5, %v59_v15 }
  0x93   :  { %v120_v16 = vpop.eup %119 }
  0x94   :  { %v68_v17 = vmul.f32 %v120_v16, %v66_v12  ;;  %vm74_vm2 = vweird.f32 %v120_v16  ;;  %v61_v22 = vmul.f32 %v118_v11, %v60_v18 }
  0x95   :  { %vm75_vm6 = vmor %vm73_vm4, %vm74_vm2 }
  0x96   :  { %v69_v19 = vmul.f32 %v120_v16, %v68_v17  ;;  %v65_v25 = vsel %vm64_vm5, %v118_v11, %v61_v22 }
  0x98   :  { %v70_v20 = vmul.f32 0.5, %v69_v19 }
  0x9a   :  { %v71_v21 = vsub.f32 1.5, %v70_v20 }
  0x9c   :  { %v72_v23 = vmul.f32 %v120_v16, %v71_v21 }
  0x9e   :  { %v76_v26 = vsel %vm75_vm6, %v120_v16, %v72_v23 }
  0x9f   :  { %v77_v27 = vmul.f32 %v76_v26, %v65_v25 }
  0xa1   :  { %v78_v28 = vmul.f32 %v77_v27, %v54_v24 }
  0xa3   :  { %v79_v29 = vmul.f32 2.0, %v78_v28 }
  0xa5   :  { %v80_v30 = vsub.f32 2.0, %v79_v29 }
  0xa7   :  { %v82_v31 = vsel %vm81_vm7, %v80_v30, 0.0 }
  0xa8   :  { %83 = vadd.xlane.f32.xlu1 %v82_v31 }
 0x11b   :  { %v84_v32 = vpop.xlane.xlu1 %83 }
 0x11c   :  { %v85_v33 = vrot.slane %v84_v32, 4 }
 0x11e   :  { %v86_v34 = vadd.f32 %v85_v33, %v84_v32 }
 0x120   :  { %v87_v35 = vrot.slane %v86_v34, 2 }
 0x122   :  { %v88_v36 = vadd.f32 %v87_v35, %v86_v34 }
 0x124   :  { %v89_v37 = vrot.slane %v88_v36, 1 }
 0x126   :  { %v90_v38 = vadd.f32 %v89_v37, %v88_v36 }
 0x128   :  { %112 = vpush %v90_v38 }
 0x159   :  { %s113_s22 = spop %112 }
 0x15a   :  { %v92_v39 = vstv %s113_s22 }
 0x15b   :  { %93 = vst [vmem:[#allocation7] sm:$0x1] %v92_v39 }
 0x15c   :  { %104 = dma.vmem_to_hbm [thread:$0]  %s100_s1, 16, %s102_s21, [#allocation4]  }
 0x15d   :  { %197 = dma.done.wait [#allocation4], 16  }
 0x15e   :  { %198 = vsyncadd [#allocation4], 4294967280 }
 0x15f   :  { %109 = vsyncpa [#allocation3], 1 }
 0x160   :  { %110 = vsyncpa [#allocation6], 1 }
 0x161   :  { %111 = vsyncpa [#allocation4], 1 }

</bundles_post_ra>
